<compile_context>
chip_gen: v7x
topology: tpu7x:2x2x1
jax: 0.10.0
libtpu: 0.0.40
codegen_flags: <defaults>
</compile_context>

<pallas_src>
import math

import jax
import jax.numpy as jnp
from jax.experimental import pallas as pl
from jax.experimental.pallas import tpu as pltpu


# sublane multiple per element size (f32 -> 8, bf16/f16 -> 16, int8/fp8 -> 32)
_SUBLANE_FOR_ITEMSIZE = {4: 8, 2: 16, 1: 32}


def _copy_kernel(x_ref, o_ref):
    # Identity copy: the reshape itself is metadata; the only work a physical
    # "view" implies is streaming the bytes HBM -> VMEM -> HBM.
    o_ref[...] = x_ref[...]


def _vmem_budget():
    """(block_bytes, vmem_limit_bytes), generation aware."""
    try:
        cap = pltpu.get_tpu_info().vmem_capacity_bytes
    except Exception:  # pragma: no cover - conservative default off-TPU/older jax
        cap = 128 << 20
    if cap <= (64 << 20):
        # v7x: half the VMEM of v5e/v6e -> ~4 MiB blocks, <=48 MiB scoped limit.
        return 4 << 20, 48 << 20
    # v5e/v6e: ~8 MiB blocks; explicit 64 MiB limit (v5e default is only 16 MiB).
    return 8 << 20, 64 << 20


def _pick_row_tile(rows, sub, lanes, itemsize, block_bytes):
    """Row tile from a pure byte budget, rounded down to the sublane multiple."""
    budget_rows = max(sub, (block_bytes // (lanes * itemsize)) // sub * sub)
    row_tile = min(rows, budget_rows)

    steps = pl.cdiv(rows, row_tile)
    # Keep an even count >= 4 of grid steps when the slab allows it, so both
    # v7x TensorCores stream and input/output DMAs pipeline within each core.
    if steps < 4 and rows >= 4 * sub:
        row_tile = max(sub, (rows // 4) // sub * sub)
        steps = pl.cdiv(rows, row_tile)
    if steps > 1 and steps % 2 == 1 and row_tile > sub:
        cand = row_tile - sub
        if pl.cdiv(rows, cand) % 2 == 0:
            row_tile = cand
    return row_tile


def view_pallas(x, target_shape, *, force_copy=False, min_bytes=4 << 20):
    """Reproduces View.forward: out = x.reshape(batch, *target_shape).

    Default: metadata-only reshape (zero HBM traffic).  When force_copy=True a
    Pallas streaming-copy kernel materializes the result, provided the size /
    alignment make the kernel path worthwhile; otherwise it still reshapes.
    """
    batch = x.shape[0]
    flat_feats = math.prod(x.shape[1:])
    tgt_feats = math.prod(target_shape)
    assert tgt_feats == flat_feats, "target shape incompatible with input size"
    out_shape = (batch,) + tuple(target_shape)

    if not force_copy:
        return x.reshape(out_shape)          # pure metadata: the fast path

    total = batch * flat_feats
    itemsize = jnp.dtype(x.dtype).itemsize
    if itemsize not in _SUBLANE_FOR_ITEMSIZE:
        return x.reshape(out_shape)          # unsupported dtype layout for kernel path
    sub = _SUBLANE_FOR_ITEMSIZE[itemsize]

    # Tiny tensors: pallas_call launch + pipeline ramp dominate; reshape wins.
    if total * itemsize < min_bytes:
        return x.reshape(out_shape)

    # The kernel path needs the flat size to map onto a dense (sub x 128) slab.
    if total == 0 or total % (sub * 128) != 0:
        return x.reshape(out_shape)

    # Pick a lane width: the largest multiple of 128 (up to 2048) such that the
    # resulting row count stays a multiple of the sublane count.
    lanes = 128
    for cand in (2048, 1024, 512, 256, 128):
        if total % (sub * cand) == 0:
            lanes = cand
            break
    rows = total // lanes                    # multiple of `sub` by construction

    block_bytes, vmem_limit = _vmem_budget()
    row_tile = _pick_row_tile(rows, sub, lanes, itemsize, block_bytes)
    grid_steps = pl.cdiv(rows, row_tile)     # Pallas clamps the partial last block

    x_slab = x.reshape(rows, lanes)          # glue: metadata-only reshape

    out_slab = pl.pallas_call(
        _copy_kernel,
        out_shape=jax.ShapeDtypeStruct((rows, lanes), x.dtype),
        grid_spec=pltpu.PrefetchScalarGridSpec(
            num_scalar_prefetch=0,
            grid=(grid_steps,),
            in_specs=[pl.BlockSpec((row_tile, lanes), lambda i: (i, 0))],
            out_specs=pl.BlockSpec((row_tile, lanes), lambda i: (i, 0)),
        ),
        compiler_params=pltpu.CompilerParams(
            dimension_semantics=("parallel",),
            vmem_limit_bytes=vmem_limit,
        ),
    )(x_slab)

    return out_slab.reshape(out_shape)       # glue: metadata-only reshape


if __name__ == "__main__":
    key = jax.random.PRNGKey(0)

    # Input consistent with an NCHW conv activation: (B=2, C=4, H=16, W=16)
    x = jax.random.normal(key, (2, 4, 16, 16), dtype=jnp.float32)
    target_shape = (4, 256)                  # View(shape=(4, 256)) -> out (2, 4, 256)
    ref = x.reshape((x.shape[0],) + target_shape)

    # 1) Default path: metadata-only reshape (the recommended, zero-cost route).
    out = jax.block_until_ready(view_pallas(x, target_shape))
    assert out.shape == (2, 4, 256)
    assert out.dtype == x.dtype
    assert jnp.array_equal(out, ref)

    # 2) Explicit physical-copy path exercises the Pallas kernel
    #    (min_bytes=0 so the small demo tensor actually takes the kernel route).
    out_copy = jax.block_until_ready(
        view_pallas(x, target_shape, force_copy=True, min_bytes=0))
    assert out_copy.shape == (2, 4, 256)
    assert jnp.array_equal(out_copy, ref)

    # 3) Awkward (non 8x128-divisible) size exercises the reshape fallback even
    #    when a copy is requested.
    key2 = jax.random.PRNGKey(1)
    y = jax.random.normal(key2, (2, 3, 5, 7), dtype=jnp.float32)
    out2 = jax.block_until_ready(view_pallas(y, (105,), force_copy=True, min_bytes=0))
    assert jnp.array_equal(out2, y.reshape(2, 105))

    print("KERNEL_OK")
</pallas_src>

<mosaic_0001>
module attributes {stable_mosaic.version = 11 : i64} {
  func.func @_copy_kernel(%arg0: i32, %arg1: memref<8x256xf32, #tpu.memory_space<vmem>>, %arg2: memref<8x256xf32, #tpu.memory_space<vmem>>) attributes {dimension_semantics = [#tpu.dimension_semantics<parallel>], iteration_bounds = array<i64: 1>, scalar_prefetch = 0 : i64, scratch_operands = 0 : i64, tpu.core_type = #tpu.core_type<tc>, window_params = [{transform_indices = @transform_0, window_bounds = array<i64: 8, 256>}, {transform_indices = @transform_1, window_bounds = array<i64: 8, 256>}]} {
    %c0 = arith.constant 0 : index
    %c0_0 = arith.constant 0 : index
    %0 = vector.load %arg1[%c0, %c0_0] : memref<8x256xf32, #tpu.memory_space<vmem>>, vector<8x256xf32>
    %c0_1 = arith.constant 0 : index
    %c0_2 = arith.constant 0 : index
    %1 = vector.load %arg2[%c0_1, %c0_2] : memref<8x256xf32, #tpu.memory_space<vmem>>, vector<8x256xf32>
    tpu.vector_store %arg2[%c0_1, %c0_2], %0 {strides = array<i32>} : memref<8x256xf32, #tpu.memory_space<vmem>>, vector<8x256xf32>,
    return
  }
  func.func @transform_0(%arg0: i32) -> (i32, i32) {
    %c0_i32 = arith.constant 0 : i32
    %c0_i32_0 = arith.constant 0 : i32
    return %arg0, %c0_i32 : i32, i32
  }
  func.func @transform_1(%arg0: i32) -> (i32, i32) {
    %c0_i32 = arith.constant 0 : i32
    %c0_i32_0 = arith.constant 0 : i32
    return %arg0, %c0_i32 : i32, i32
  }
}

</mosaic_0001>

<bundles_post_ra>
// kernel: tpu_custom_call.1
= control target key start
LH: loop header
LB: loop body
LE: loop exit
PB: predicated region body
PF: predicated region fallthrough
CT: control target
= control target key end

     0   :  { %6 = vsyncpa [#allocation3], 0  ;;  %s126_s0 = inlined_call_operand.hbm [shape: f32[8,256], index: 0, kind: input, shape index: {}]   ;;  %s127_s1 = inlined_call_operand.hbm [shape: f32[8,256], index: 1, kind: output, shape index: {}]  }
   0x1   :  { %7 = vsyncpa [#allocation4], 0  ;;  %s90_s6 = smov [#allocation2]   ;;  %s42_s10 = scalar_lea.hbm %s126_s0, 256 }
   0x2   :  { %s14_s7 = sshll.u32 %s90_s6, 4  ;;  %p43_p0 = scmp.ne.s32.totalorder %s126_s0, %s42_s10  ;;  %s15_s7 = int_to_ptr.vmem [resolvable:$true] %s14_s7 }
   0x3   :  { %p46_p1 = scmp.lt.u32.totalorder %s42_s10, %s126_s0 }
   0x5   :  { %p48_p2 = pnand %p46_p1, %p43_p0 }
   0x7   :  { %51 = shalt.err (!%p48_p2)
}
   0x8   :  { %s52_s15 = scalar_lea.vmem %s15_s7, 256  ;;  %p57_p4 = scmp.lt.s32.totalorder %s15_s7, %s15_s7 }
   0x9   :  { %p53_p3 = scmp.ne.s32.totalorder %s15_s7, %s52_s15  ;;  %p58_p5 = scmp.lt.s32.totalorder %s52_s15, %s52_s15 }
   0xb   :  { %p59_p6 = por %p58_p5, %p57_p4 }
   0xd   :  { %p60_p7 = pnand %p59_p6, %p53_p3 }
   0xf   :  { %63 = shalt.err (!%p60_p7)
}
  0x10   :  { %17 = dma.hbm_to_vmem [thread:$0]  %s126_s0, 256, %s15_s7, [#allocation3]  }
  0x11   :  { %86 = dma.done.wait [#allocation3], 256  }
  0x12   :  { %87 = vsyncadd [#allocation3], 4294967040  ;;  %s91_s18 = smov [#allocation5]   ;;  %v21_v0 = vld [vmem:[#allocation2] sm:$0xff]  ;;  %v22_v1 = vld [vmem:[#allocation2 + $0x8] sm:$0xff] }
  0x13   :  { %s31_s19 = sshll.u32 %s91_s18, 4  ;;  %23 = vst [vmem:[#allocation5] sm:$0xff] %v21_v0  ;;  %24 = vst [vmem:[#allocation5 + $0x8] sm:$0xff] %v22_v1  ;;  %s32_s19 = int_to_ptr.vmem [resolvable:$true] %s31_s19 }
  0x14   :  { %s64_s20 = scalar_lea.vmem %s32_s19, 256  ;;  %p69_p9 = scmp.lt.s32.totalorder %s32_s19, %s32_s19 }
  0x15   :  { %p65_p8 = scmp.ne.s32.totalorder %s32_s19, %s64_s20  ;;  %p70_p10 = scmp.lt.s32.totalorder %s64_s20, %s64_s20 }
  0x17   :  { %p71_p11 = por %p70_p10, %p69_p9 }
  0x19   :  { %p72_p12 = pnand %p71_p11, %p65_p8 }
  0x1b   :  { %75 = shalt.err (!%p72_p12)
}
  0x1c   :  { %s76_s0 = scalar_lea.hbm %s127_s1, 256 }
  0x1d   :  { %p77_p13 = scmp.ne.s32.totalorder %s127_s1, %s76_s0  ;;  %p80_p0 = scmp.lt.u32.totalorder %s76_s0, %s127_s1 }
  0x1f   :  { %p82_p1 = pnand %p80_p0, %p77_p13 }
  0x21   :  { %85 = shalt.err (!%p82_p1)
}
  0x22   :  { %34 = dma.vmem_to_hbm [thread:$0]  %s32_s19, 256, %s127_s1, [#allocation4]  }
  0x23   :  { %88 = dma.done.wait [#allocation4], 256  }
  0x24   :  { %89 = vsyncadd [#allocation4], 4294967040 }
  0x25   :  { %38 = vsyncpa [#allocation3], 1 }
  0x26   :  { %39 = vsyncpa [#allocation4], 1 }

</bundles_post_ra>
